<compile_context>
chip_gen: v6e
topology: v6e:2x2x1
jax: 0.10.0
libtpu: 0.0.40
codegen_flags: <defaults>
</compile_context>

<pallas_src>
import functools

import jax
import jax.numpy as jnp
from jax.experimental import pallas as pl
from jax.experimental.pallas import tpu as pltpu

_LANE = 128
_SUBLANE = 8
_MAX_TILE_ROWS = 2048      # (2048, 128) f32 tile = 1 MiB; x,y double-buffered -> ~4 MiB in flight
_NUM_CORE_SPLITS = 2       # leading "parallel" axis (megacore split on v7x; cheap loop elsewhere)


def _round_up(a: int, b: int) -> int:
    return ((a + b - 1) // b) * b


def _npcl_sums_kernel(x_ref, y_ref, acc_ref, *, rows, tile_r, tiles_total,
                      tiles_per_split):
    c = pl.program_id(0)
    i = pl.program_id(1)

    @pl.when(i == 0)
    def _init():
        acc_ref[...] = jnp.zeros_like(acc_ref)

    # Global tile index for this step.  The index_map clamps it so the DMA stays
    # in bounds; overshoot tiles (valid == 0) are skipped, padded rows of the
    # single partial tile are masked.
    g = c * tiles_per_split + i
    valid = jnp.where(g < tiles_total,
                      jnp.minimum(rows - g * tile_r, tile_r), 0)

    x = x_ref[...].astype(jnp.float32)
    y = y_ref[...].astype(jnp.float32)

    def _accum(xv, yv):
        nsub = tile_r // _SUBLANE

        def fold(v):
            # (tile_r, 128) -> (nsub, 8, 128): axis-0 sum lowers to plain VPU
            # vreg adds (no XLU lane reduce), keeping (8,128) vreg tiles intact.
            return jnp.sum(v.reshape(nsub, _SUBLANE, _LANE), axis=0)

        acc_ref[0, :, :] += fold(xv)
        acc_ref[1, :, :] += fold(yv)
        acc_ref[2, :, :] += fold(xv * xv)
        acc_ref[3, :, :] += fold(yv * yv)
        acc_ref[4, :, :] += fold(xv * yv)

    @pl.when(valid == tile_r)                                  # full tile: mask-free hot path
    def _full():
        _accum(x, y)

    @pl.when(jnp.logical_and(valid > 0, valid < tile_r))      # the single partial tail tile
    def _partial():
        row_ids = jax.lax.broadcasted_iota(jnp.int32, (tile_r, _LANE), 0)
        m = row_ids < valid
        _accum(jnp.where(m, x, 0.0), jnp.where(m, y, 0.0))


def _jnp_reference(x, y):
    vx = x - jnp.mean(x)
    vy = y - jnp.mean(y)
    return -jnp.sum(vx * vy) / (
        jnp.sqrt(jnp.sum(vx * vx)) * jnp.sqrt(jnp.sum(vy * vy)))


def negative_pearson_correlation_loss(x: jax.Array, y: jax.Array) -> jax.Array:
    """Pallas TPU implementation of NegativePearsonCorrelationLoss.forward."""
    assert x.shape == y.shape, "x and y must have the same shape"
    n_total = int(x.size)

    xf = x.reshape(-1)
    yf = y.reshape(-1)

    rows = n_total // _LANE
    rem = n_total - rows * _LANE

    if rows == 0:
        # Fewer than 128 elements: not worth a kernel launch.
        return _jnp_reference(xf.astype(jnp.float32), yf.astype(jnp.float32))

    tile_r = min(_MAX_TILE_ROWS, _round_up(rows, _SUBLANE))
    tiles_total = int(pl.cdiv(rows, tile_r))
    num_splits = _NUM_CORE_SPLITS if tiles_total >= _NUM_CORE_SPLITS else 1
    tiles_per_split = int(pl.cdiv(tiles_total, num_splits))

    # Lane-dense prefix view; no pad, no dtype upcast in HBM.
    # TODO(synk): when x.size % 128 != 0 this prefix slice may materialize one
    # extra copy in XLA; acceptable since common NCHW sizes are 128-divisible.
    x2d = xf[: rows * _LANE].reshape(rows, _LANE)
    y2d = yf[: rows * _LANE].reshape(rows, _LANE)

    kernel = functools.partial(
        _npcl_sums_kernel, rows=rows, tile_r=tile_r,
        tiles_total=tiles_total, tiles_per_split=tiles_per_split)

    def in_map(c, i):
        return (jnp.minimum(c * tiles_per_split + i, tiles_total - 1), 0)

    acc = pl.pallas_call(
        kernel,
        out_shape=jax.ShapeDtypeStruct((num_splits, 5, _SUBLANE, _LANE),
                                       jnp.float32),
        grid=(num_splits, tiles_per_split),
        in_specs=[
            pl.BlockSpec((tile_r, _LANE), in_map),
            pl.BlockSpec((tile_r, _LANE), in_map),
        ],
        out_specs=pl.BlockSpec((None, 5, _SUBLANE, _LANE),
                               lambda c, i: (c, 0, 0, 0)),
        compiler_params=pltpu.CompilerParams(
            dimension_semantics=("parallel", "arbitrary")),
        cost_estimate=pl.CostEstimate(
            flops=8 * n_total,
            transcendentals=0,
            bytes_accessed=2 * n_total * x.dtype.itemsize
                           + num_splits * 5 * _SUBLANE * _LANE * 4),
    )(x2d, y2d)

    sums = jnp.sum(acc, axis=(0, 2, 3))            # (5,) final tiny reduce
    sx, sy, sxx, syy, sxy = sums[0], sums[1], sums[2], sums[3], sums[4]

    if rem:
        # sub-128-element tail (at most 127 elems) handled in plain jnp
        xt = xf[rows * _LANE:].astype(jnp.float32)
        yt = yf[rows * _LANE:].astype(jnp.float32)
        sx = sx + jnp.sum(xt)
        sy = sy + jnp.sum(yt)
        sxx = sxx + jnp.sum(xt * xt)
        syy = syy + jnp.sum(yt * yt)
        sxy = sxy + jnp.sum(xt * yt)

    n = jnp.float32(n_total)
    mx = sx / n
    my = sy / n
    num = sxy - n * mx * my
    den = jnp.sqrt(sxx - n * mx * mx) * jnp.sqrt(syy - n * my * my)
    # Matches the PyTorch module: no epsilon (constant input -> nan/inf).
    return -num / den


if __name__ == "__main__":
    key = jax.random.PRNGKey(0)
    kx, ky = jax.random.split(key)
    # Small NCHW-like predictions / targets consistent with the module's usage.
    x = jax.random.normal(kx, (2, 4, 16, 16), dtype=jnp.float32)
    y = jax.random.normal(ky, (2, 4, 16, 16), dtype=jnp.float32) + 0.5 * x

    loss = jax.jit(negative_pearson_correlation_loss)(x, y)
    jax.block_until_ready(loss)

    ref = _jnp_reference(x.astype(jnp.float32), y.astype(jnp.float32))
    assert jnp.allclose(loss, ref, atol=1e-5, rtol=1e-4), (loss, ref)

    print("KERNEL_OK")
</pallas_src>

<mosaic_0001>
module attributes {stable_mosaic.version = 11 : i64} {
  func.func @_npcl_sums_kernel(%arg0: i32, %arg1: i32, %arg2: memref<16x128xf32, #tpu.memory_space<vmem>>, %arg3: memref<16x128xf32, #tpu.memory_space<vmem>>, %arg4: memref<1x5x8x128xf32, #tpu.memory_space<vmem>>) attributes {dimension_semantics = [#tpu.dimension_semantics<parallel>, #tpu.dimension_semantics<arbitrary>], iteration_bounds = array<i64: 1, 1>, scalar_prefetch = 0 : i64, scratch_operands = 0 : i64, tpu.core_type = #tpu.core_type<tc>, window_params = [{transform_indices = @transform_0, window_bounds = array<i64: 16, 128>}, {transform_indices = @transform_1, window_bounds = array<i64: 16, 128>}, {transform_indices = @transform_2, window_bounds = array<i64: 1, 5, 8, 128>}]} {
    %c0_i32 = arith.constant 0 : i32
    %0 = arith.cmpi eq, %arg1, %c0_i32 : i32
    %1 = arith.extui %0 : i1 to i32
    %c0_i32_0 = arith.constant 0 : i32
    %2 = arith.cmpi ne, %1, %c0_i32_0 : i32
    scf.if %2 {
      %cst = arith.constant 0.000000e+00 : f32
      %20 = vector.broadcast %cst : f32 to vector<5x8x128xf32>
      %c0_13 = arith.constant 0 : index
      %c0_14 = arith.constant 0 : index
      %c0_15 = arith.constant 0 : index
      %c0_16 = arith.constant 0 : index
      %21 = vector.load %arg4[%c0_13, %c0_14, %c0_15, %c0_16] : memref<1x5x8x128xf32, #tpu.memory_space<vmem>>, vector<1x5x8x128xf32>
      %22 = vector.shape_cast %21 : vector<1x5x8x128xf32> to vector<5x8x128xf32>
      %23 = vector.shape_cast %20 : vector<5x8x128xf32> to vector<1x5x8x128xf32>
      tpu.vector_store %arg4[%c0_13, %c0_14, %c0_15, %c0_16], %23 {strides = array<i32>} : memref<1x5x8x128xf32, #tpu.memory_space<vmem>>, vector<1x5x8x128xf32>,
    } else {
    }
    %c1_i32 = arith.constant 1 : i32
    %3 = arith.muli %arg0, %c1_i32 : i32
    %4 = arith.addi %3, %arg1 : i32
    %c1_i32_1 = arith.constant 1 : i32
    %5 = arith.cmpi slt, %4, %c1_i32_1 : i32
    %c16_i32 = arith.constant 16 : i32
    %6 = arith.muli %4, %c16_i32 : i32
    %c16_i32_2 = arith.constant 16 : i32
    %7 = arith.subi %c16_i32_2, %6 : i32
    %c16_i32_3 = arith.constant 16 : i32
    %8 = arith.minsi %7, %c16_i32_3 : i32
    %c0_i32_4 = arith.constant 0 : i32
    %9 = arith.select %5, %8, %c0_i32_4 : i32
    %c0 = arith.constant 0 : index
    %c0_5 = arith.constant 0 : index
    %10 = vector.load %arg2[%c0, %c0_5] : memref<16x128xf32, #tpu.memory_space<vmem>>, vector<16x128xf32>
    %c0_6 = arith.constant 0 : index
    %c0_7 = arith.constant 0 : index
    %11 = vector.load %arg3[%c0_6, %c0_7] : memref<16x128xf32, #tpu.memory_space<vmem>>, vector<16x128xf32>
    %c16_i32_8 = arith.constant 16 : i32
    %12 = arith.cmpi eq, %9, %c16_i32_8 : i32
    %13 = arith.extui %12 : i1 to i32
    %c0_i32_9 = arith.constant 0 : i32
    %14 = arith.cmpi ne, %13, %c0_i32_9 : i32
    scf.if %14 {
      %c0_13 = arith.constant 0 : index
      %c0_14 = arith.constant 0 : index
      %c0_15 = arith.constant 0 : index
      %c0_16 = arith.constant 0 : index
      %20 = vector.load %arg4[%c0_13, %c0_14, %c0_15, %c0_16] : memref<1x5x8x128xf32, #tpu.memory_space<vmem>>, vector<1x1x8x128xf32>
      %21 = vector.shape_cast %20 : vector<1x1x8x128xf32> to vector<8x128xf32>
      %22 = vector.shape_cast %10 : vector<16x128xf32> to vector<2x8x128xf32>
      %cst = arith.constant dense<0.000000e+00> : vector<8x128xf32>
      %23 = vector.multi_reduction <add>, %22, %cst [0] : vector<2x8x128xf32> to vector<8x128xf32>
      %24 = arith.addf %21, %23 : vector<8x128xf32>
      %c0_17 = arith.constant 0 : index
      %c0_18 = arith.constant 0 : index
      %c0_19 = arith.constant 0 : index
      %c0_20 = arith.constant 0 : index
      %25 = vector.load %arg4[%c0_17, %c0_18, %c0_19, %c0_20] : memref<1x5x8x128xf32, #tpu.memory_space<vmem>>, vector<1x1x8x128xf32>
      %26 = vector.shape_cast %25 : vector<1x1x8x128xf32> to vector<8x128xf32>
      %27 = vector.shape_cast %24 : vector<8x128xf32> to vector<1x1x8x128xf32>
      tpu.vector_store %arg4[%c0_17, %c0_18, %c0_19, %c0_20], %27 {strides = array<i32>} : memref<1x5x8x128xf32, #tpu.memory_space<vmem>>, vector<1x1x8x128xf32>,
      %c0_21 = arith.constant 0 : index
      %c1 = arith.constant 1 : index
      %c0_22 = arith.constant 0 : index
      %c0_23 = arith.constant 0 : index
      %28 = vector.load %arg4[%c0_21, %c1, %c0_22, %c0_23] : memref<1x5x8x128xf32, #tpu.memory_space<vmem>>, vector<1x1x8x128xf32>
      %29 = vector.shape_cast %28 : vector<1x1x8x128xf32> to vector<8x128xf32>
      %30 = vector.shape_cast %11 : vector<16x128xf32> to vector<2x8x128xf32>
      %cst_24 = arith.constant dense<0.000000e+00> : vector<8x128xf32>
      %31 = vector.multi_reduction <add>, %30, %cst_24 [0] : vector<2x8x128xf32> to vector<8x128xf32>
      %32 = arith.addf %29, %31 : vector<8x128xf32>
      %c0_25 = arith.constant 0 : index
      %c1_26 = arith.constant 1 : index
      %c0_27 = arith.constant 0 : index
      %c0_28 = arith.constant 0 : index
      %33 = vector.load %arg4[%c0_25, %c1_26, %c0_27, %c0_28] : memref<1x5x8x128xf32, #tpu.memory_space<vmem>>, vector<1x1x8x128xf32>
      %34 = vector.shape_cast %33 : vector<1x1x8x128xf32> to vector<8x128xf32>
      %35 = vector.shape_cast %32 : vector<8x128xf32> to vector<1x1x8x128xf32>
      tpu.vector_store %arg4[%c0_25, %c1_26, %c0_27, %c0_28], %35 {strides = array<i32>} : memref<1x5x8x128xf32, #tpu.memory_space<vmem>>, vector<1x1x8x128xf32>,
      %c0_29 = arith.constant 0 : index
      %c2 = arith.constant 2 : index
      %c0_30 = arith.constant 0 : index
      %c0_31 = arith.constant 0 : index
      %36 = vector.load %arg4[%c0_29, %c2, %c0_30, %c0_31] : memref<1x5x8x128xf32, #tpu.memory_space<vmem>>, vector<1x1x8x128xf32>
      %37 = vector.shape_cast %36 : vector<1x1x8x128xf32> to vector<8x128xf32>
      %38 = arith.mulf %10, %10 : vector<16x128xf32>
      %39 = vector.shape_cast %38 : vector<16x128xf32> to vector<2x8x128xf32>
      %cst_32 = arith.constant dense<0.000000e+00> : vector<8x128xf32>
      %40 = vector.multi_reduction <add>, %39, %cst_32 [0] : vector<2x8x128xf32> to vector<8x128xf32>
      %41 = arith.addf %37, %40 : vector<8x128xf32>
      %c0_33 = arith.constant 0 : index
      %c2_34 = arith.constant 2 : index
      %c0_35 = arith.constant 0 : index
      %c0_36 = arith.constant 0 : index
      %42 = vector.load %arg4[%c0_33, %c2_34, %c0_35, %c0_36] : memref<1x5x8x128xf32, #tpu.memory_space<vmem>>, vector<1x1x8x128xf32>
      %43 = vector.shape_cast %42 : vector<1x1x8x128xf32> to vector<8x128xf32>
      %44 = vector.shape_cast %41 : vector<8x128xf32> to vector<1x1x8x128xf32>
      tpu.vector_store %arg4[%c0_33, %c2_34, %c0_35, %c0_36], %44 {strides = array<i32>} : memref<1x5x8x128xf32, #tpu.memory_space<vmem>>, vector<1x1x8x128xf32>,
      %c0_37 = arith.constant 0 : index
      %c3 = arith.constant 3 : index
      %c0_38 = arith.constant 0 : index
      %c0_39 = arith.constant 0 : index
      %45 = vector.load %arg4[%c0_37, %c3, %c0_38, %c0_39] : memref<1x5x8x128xf32, #tpu.memory_space<vmem>>, vector<1x1x8x128xf32>
      %46 = vector.shape_cast %45 : vector<1x1x8x128xf32> to vector<8x128xf32>
      %47 = arith.mulf %11, %11 : vector<16x128xf32>
      %48 = vector.shape_cast %47 : vector<16x128xf32> to vector<2x8x128xf32>
      %cst_40 = arith.constant dense<0.000000e+00> : vector<8x128xf32>
      %49 = vector.multi_reduction <add>, %48, %cst_40 [0] : vector<2x8x128xf32> to vector<8x128xf32>
      %50 = arith.addf %46, %49 : vector<8x128xf32>
      %c0_41 = arith.constant 0 : index
      %c3_42 = arith.constant 3 : index
      %c0_43 = arith.constant 0 : index
      %c0_44 = arith.constant 0 : index
      %51 = vector.load %arg4[%c0_41, %c3_42, %c0_43, %c0_44] : memref<1x5x8x128xf32, #tpu.memory_space<vmem>>, vector<1x1x8x128xf32>
      %52 = vector.shape_cast %51 : vector<1x1x8x128xf32> to vector<8x128xf32>
      %53 = vector.shape_cast %50 : vector<8x128xf32> to vector<1x1x8x128xf32>
      tpu.vector_store %arg4[%c0_41, %c3_42, %c0_43, %c0_44], %53 {strides = array<i32>} : memref<1x5x8x128xf32, #tpu.memory_space<vmem>>, vector<1x1x8x128xf32>,
      %c0_45 = arith.constant 0 : index
      %c4 = arith.constant 4 : index
      %c0_46 = arith.constant 0 : index
      %c0_47 = arith.constant 0 : index
      %54 = vector.load %arg4[%c0_45, %c4, %c0_46, %c0_47] : memref<1x5x8x128xf32, #tpu.memory_space<vmem>>, vector<1x1x8x128xf32>
      %55 = vector.shape_cast %54 : vector<1x1x8x128xf32> to vector<8x128xf32>
      %56 = arith.mulf %10, %11 : vector<16x128xf32>
      %57 = vector.shape_cast %56 : vector<16x128xf32> to vector<2x8x128xf32>
      %cst_48 = arith.constant dense<0.000000e+00> : vector<8x128xf32>
      %58 = vector.multi_reduction <add>, %57, %cst_48 [0] : vector<2x8x128xf32> to vector<8x128xf32>
      %59 = arith.addf %55, %58 : vector<8x128xf32>
      %c0_49 = arith.constant 0 : index
      %c4_50 = arith.constant 4 : index
      %c0_51 = arith.constant 0 : index
      %c0_52 = arith.constant 0 : index
      %60 = vector.load %arg4[%c0_49, %c4_50, %c0_51, %c0_52] : memref<1x5x8x128xf32, #tpu.memory_space<vmem>>, vector<1x1x8x128xf32>
      %61 = vector.shape_cast %60 : vector<1x1x8x128xf32> to vector<8x128xf32>
      %62 = vector.shape_cast %59 : vector<8x128xf32> to vector<1x1x8x128xf32>
      tpu.vector_store %arg4[%c0_49, %c4_50, %c0_51, %c0_52], %62 {strides = array<i32>} : memref<1x5x8x128xf32, #tpu.memory_space<vmem>>, vector<1x1x8x128xf32>,
    } else {
    }
    %c0_i32_10 = arith.constant 0 : i32
    %15 = arith.cmpi sgt, %9, %c0_i32_10 : i32
    %c16_i32_11 = arith.constant 16 : i32
    %16 = arith.cmpi slt, %9, %c16_i32_11 : i32
    %17 = arith.andi %15, %16 : i1
    %18 = arith.extui %17 : i1 to i32
    %c0_i32_12 = arith.constant 0 : i32
    %19 = arith.cmpi ne, %18, %c0_i32_12 : i32
    scf.if %19 {
      %20 = tpu.iota {dimensions = array<i32: 0>} : vector<16x128xi32>
      %21 = vector.broadcast %9 : i32 to vector<16x128xi32>
      %22 = arith.cmpi slt, %20, %21 : vector<16x128xi32>
      %cst = arith.constant 0.000000e+00 : f32
      %23 = vector.broadcast %cst : f32 to vector<16x128xf32>
      %24 = arith.select %22, %10, %23 : vector<16x128xi1>, vector<16x128xf32>
      %cst_13 = arith.constant 0.000000e+00 : f32
      %25 = vector.broadcast %cst_13 : f32 to vector<16x128xf32>
      %26 = arith.select %22, %11, %25 : vector<16x128xi1>, vector<16x128xf32>
      %c0_14 = arith.constant 0 : index
      %c0_15 = arith.constant 0 : index
      %c0_16 = arith.constant 0 : index
      %c0_17 = arith.constant 0 : index
      %27 = vector.load %arg4[%c0_14, %c0_15, %c0_16, %c0_17] : memref<1x5x8x128xf32, #tpu.memory_space<vmem>>, vector<1x1x8x128xf32>
      %28 = vector.shape_cast %27 : vector<1x1x8x128xf32> to vector<8x128xf32>
      %29 = vector.shape_cast %24 : vector<16x128xf32> to vector<2x8x128xf32>
      %cst_18 = arith.constant dense<0.000000e+00> : vector<8x128xf32>
      %30 = vector.multi_reduction <add>, %29, %cst_18 [0] : vector<2x8x128xf32> to vector<8x128xf32>
      %31 = arith.addf %28, %30 : vector<8x128xf32>
      %c0_19 = arith.constant 0 : index
      %c0_20 = arith.constant 0 : index
      %c0_21 = arith.constant 0 : index
      %c0_22 = arith.constant 0 : index
      %32 = vector.load %arg4[%c0_19, %c0_20, %c0_21, %c0_22] : memref<1x5x8x128xf32, #tpu.memory_space<vmem>>, vector<1x1x8x128xf32>
      %33 = vector.shape_cast %32 : vector<1x1x8x128xf32> to vector<8x128xf32>
      %34 = vector.shape_cast %31 : vector<8x128xf32> to vector<1x1x8x128xf32>
      tpu.vector_store %arg4[%c0_19, %c0_20, %c0_21, %c0_22], %34 {strides = array<i32>} : memref<1x5x8x128xf32, #tpu.memory_space<vmem>>, vector<1x1x8x128xf32>,
      %c0_23 = arith.constant 0 : index
      %c1 = arith.constant 1 : index
      %c0_24 = arith.constant 0 : index
      %c0_25 = arith.constant 0 : index
      %35 = vector.load %arg4[%c0_23, %c1, %c0_24, %c0_25] : memref<1x5x8x128xf32, #tpu.memory_space<vmem>>, vector<1x1x8x128xf32>
      %36 = vector.shape_cast %35 : vector<1x1x8x128xf32> to vector<8x128xf32>
      %37 = vector.shape_cast %26 : vector<16x128xf32> to vector<2x8x128xf32>
      %cst_26 = arith.constant dense<0.000000e+00> : vector<8x128xf32>
      %38 = vector.multi_reduction <add>, %37, %cst_26 [0] : vector<2x8x128xf32> to vector<8x128xf32>
      %39 = arith.addf %36, %38 : vector<8x128xf32>
      %c0_27 = arith.constant 0 : index
      %c1_28 = arith.constant 1 : index
      %c0_29 = arith.constant 0 : index
      %c0_30 = arith.constant 0 : index
      %40 = vector.load %arg4[%c0_27, %c1_28, %c0_29, %c0_30] : memref<1x5x8x128xf32, #tpu.memory_space<vmem>>, vector<1x1x8x128xf32>
      %41 = vector.shape_cast %40 : vector<1x1x8x128xf32> to vector<8x128xf32>
      %42 = vector.shape_cast %39 : vector<8x128xf32> to vector<1x1x8x128xf32>
      tpu.vector_store %arg4[%c0_27, %c1_28, %c0_29, %c0_30], %42 {strides = array<i32>} : memref<1x5x8x128xf32, #tpu.memory_space<vmem>>, vector<1x1x8x128xf32>,
      %c0_31 = arith.constant 0 : index
      %c2 = arith.constant 2 : index
      %c0_32 = arith.constant 0 : index
      %c0_33 = arith.constant 0 : index
      %43 = vector.load %arg4[%c0_31, %c2, %c0_32, %c0_33] : memref<1x5x8x128xf32, #tpu.memory_space<vmem>>, vector<1x1x8x128xf32>
      %44 = vector.shape_cast %43 : vector<1x1x8x128xf32> to vector<8x128xf32>
      %45 = arith.mulf %24, %24 : vector<16x128xf32>
      %46 = vector.shape_cast %45 : vector<16x128xf32> to vector<2x8x128xf32>
      %cst_34 = arith.constant dense<0.000000e+00> : vector<8x128xf32>
      %47 = vector.multi_reduction <add>, %46, %cst_34 [0] : vector<2x8x128xf32> to vector<8x128xf32>
      %48 = arith.addf %44, %47 : vector<8x128xf32>
      %c0_35 = arith.constant 0 : index
      %c2_36 = arith.constant 2 : index
      %c0_37 = arith.constant 0 : index
      %c0_38 = arith.constant 0 : index
      %49 = vector.load %arg4[%c0_35, %c2_36, %c0_37, %c0_38] : memref<1x5x8x128xf32, #tpu.memory_space<vmem>>, vector<1x1x8x128xf32>
      %50 = vector.shape_cast %49 : vector<1x1x8x128xf32> to vector<8x128xf32>
      %51 = vector.shape_cast %48 : vector<8x128xf32> to vector<1x1x8x128xf32>
      tpu.vector_store %arg4[%c0_35, %c2_36, %c0_37, %c0_38], %51 {strides = array<i32>} : memref<1x5x8x128xf32, #tpu.memory_space<vmem>>, vector<1x1x8x128xf32>,
      %c0_39 = arith.constant 0 : index
      %c3 = arith.constant 3 : index
      %c0_40 = arith.constant 0 : index
      %c0_41 = arith.constant 0 : index
      %52 = vector.load %arg4[%c0_39, %c3, %c0_40, %c0_41] : memref<1x5x8x128xf32, #tpu.memory_space<vmem>>, vector<1x1x8x128xf32>
      %53 = vector.shape_cast %52 : vector<1x1x8x128xf32> to vector<8x128xf32>
      %54 = arith.mulf %26, %26 : vector<16x128xf32>
      %55 = vector.shape_cast %54 : vector<16x128xf32> to vector<2x8x128xf32>
      %cst_42 = arith.constant dense<0.000000e+00> : vector<8x128xf32>
      %56 = vector.multi_reduction <add>, %55, %cst_42 [0] : vector<2x8x128xf32> to vector<8x128xf32>
      %57 = arith.addf %53, %56 : vector<8x128xf32>
      %c0_43 = arith.constant 0 : index
      %c3_44 = arith.constant 3 : index
      %c0_45 = arith.constant 0 : index
      %c0_46 = arith.constant 0 : index
      %58 = vector.load %arg4[%c0_43, %c3_44, %c0_45, %c0_46] : memref<1x5x8x128xf32, #tpu.memory_space<vmem>>, vector<1x1x8x128xf32>
      %59 = vector.shape_cast %58 : vector<1x1x8x128xf32> to vector<8x128xf32>
      %60 = vector.shape_cast %57 : vector<8x128xf32> to vector<1x1x8x128xf32>
      tpu.vector_store %arg4[%c0_43, %c3_44, %c0_45, %c0_46], %60 {strides = array<i32>} : memref<1x5x8x128xf32, #tpu.memory_space<vmem>>, vector<1x1x8x128xf32>,
      %c0_47 = arith.constant 0 : index
      %c4 = arith.constant 4 : index
      %c0_48 = arith.constant 0 : index
      %c0_49 = arith.constant 0 : index
      %61 = vector.load %arg4[%c0_47, %c4, %c0_48, %c0_49] : memref<1x5x8x128xf32, #tpu.memory_space<vmem>>, vector<1x1x8x128xf32>
      %62 = vector.shape_cast %61 : vector<1x1x8x128xf32> to vector<8x128xf32>
      %63 = arith.mulf %24, %26 : vector<16x128xf32>
      %64 = vector.shape_cast %63 : vector<16x128xf32> to vector<2x8x128xf32>
      %cst_50 = arith.constant dense<0.000000e+00> : vector<8x128xf32>
      %65 = vector.multi_reduction <add>, %64, %cst_50 [0] : vector<2x8x128xf32> to vector<8x128xf32>
      %66 = arith.addf %62, %65 : vector<8x128xf32>
      %c0_51 = arith.constant 0 : index
      %c4_52 = arith.constant 4 : index
      %c0_53 = arith.constant 0 : index
      %c0_54 = arith.constant 0 : index
      %67 = vector.load %arg4[%c0_51, %c4_52, %c0_53, %c0_54] : memref<1x5x8x128xf32, #tpu.memory_space<vmem>>, vector<1x1x8x128xf32>
      %68 = vector.shape_cast %67 : vector<1x1x8x128xf32> to vector<8x128xf32>
      %69 = vector.shape_cast %66 : vector<8x128xf32> to vector<1x1x8x128xf32>
      tpu.vector_store %arg4[%c0_51, %c4_52, %c0_53, %c0_54], %69 {strides = array<i32>} : memref<1x5x8x128xf32, #tpu.memory_space<vmem>>, vector<1x1x8x128xf32>,
    } else {
    }
    return
  }
  func.func @transform_0(%arg0: i32, %arg1: i32) -> (i32, i32) {
    %c1_i32 = arith.constant 1 : i32
    %0 = arith.muli %arg0, %c1_i32 : i32
    %1 = arith.addi %0, %arg1 : i32
    %c0_i32 = arith.constant 0 : i32
    %2 = arith.minsi %1, %c0_i32 : i32
    %c0_i32_0 = arith.constant 0 : i32
    %c0_i32_1 = arith.constant 0 : i32
    return %2, %c0_i32_0 : i32, i32
  }
  func.func @transform_1(%arg0: i32, %arg1: i32) -> (i32, i32) {
    %c1_i32 = arith.constant 1 : i32
    %0 = arith.muli %arg0, %c1_i32 : i32
    %1 = arith.addi %0, %arg1 : i32
    %c0_i32 = arith.constant 0 : i32
    %2 = arith.minsi %1, %c0_i32 : i32
    %c0_i32_0 = arith.constant 0 : i32
    %c0_i32_1 = arith.constant 0 : i32
    return %2, %c0_i32_0 : i32, i32
  }
  func.func @transform_2(%arg0: i32, %arg1: i32) -> (i32, i32, i32, i32) {
    %c0_i32 = arith.constant 0 : i32
    %c0_i32_0 = arith.constant 0 : i32
    %c0_i32_1 = arith.constant 0 : i32
    %c0_i32_2 = arith.constant 0 : i32
    return %arg0, %c0_i32, %c0_i32_0, %c0_i32_1 : i32, i32, i32, i32
  }
}

</mosaic_0001>

<bundles_post_ra>
// kernel: negative_pearson_correlation_loss.1
= control target key start
LH: loop header
LB: loop body
LE: loop exit
PB: predicated region body
PF: predicated region fallthrough
CT: control target
= control target key end

     0   :  { %s250_s0 = inlined_call_operand.vmem [shape: f32[16,128], index: 0, kind: input, shape index: {}]   ;;  %s251_s1 = inlined_call_operand.vmem [shape: f32[16,128], index: 1, kind: input, shape index: {}]   ;;  %s252_s2 = inlined_call_operand.vmem [shape: f32[1,5,8,128], index: 2, kind: output, shape index: {}]  }
   0x1   :  { %v91_v0 = vld [vmem:[%s250_s0] sm:$0xff]  ;;  %v92_v1 = vld [vmem:[%s250_s0 + $0x8] sm:$0xff] }
   0x2   :  { %v93_v2 = vld [vmem:[%s251_s1] sm:$0xff]  ;;  %v100_v3 = vadd.f32 %v92_v1, %v91_v0  ;;  %v94_v4 = vld [vmem:[%s251_s1 + $0x8] sm:$0xff]  ;;  %v110_v5 = vmul.f32 %v91_v0, %v91_v0  ;;  %v111_v6 = vmul.f32 %v92_v1, %v92_v1 }
   0x3   :  { %v117_v7 = vmul.f32 %v93_v2, %v93_v2  ;;  %v105_v8 = vadd.f32 %v94_v4, %v93_v2  ;;  %v118_v9 = vmul.f32 %v94_v4, %v94_v4  ;;  %v124_v10 = vmul.f32 %v93_v2, %v91_v0 }
   0x4   :  { %v125_v11 = vmul.f32 %v94_v4, %v92_v1  ;;  %v112_v12 = vadd.f32 %v111_v6, %v110_v5  ;;  %102 = vst [vmem:[%s252_s2] sm:$0xff] %v100_v3 }
   0x5   :  { %v119_v13 = vadd.f32 %v118_v9, %v117_v7  ;;  %192 = vst [vmem:[%s252_s2 + $0x8] sm:$0xff] %v105_v8 }
   0x6   :  { %v126_v14 = vadd.f32 %v125_v11, %v124_v10  ;;  %194 = vst [vmem:[%s252_s2 + $0x10] sm:$0xff] %v112_v12 }
   0x7   :  { %196 = vst [vmem:[%s252_s2 + $0x18] sm:$0xff] %v119_v13 }
   0x8   :  { %198 = vst [vmem:[%s252_s2 + $0x20] sm:$0xff] %v126_v14 }

</bundles_post_ra>
